<compile_context>
chip_gen: v7x
topology: tpu7x:2x2x1
jax: 0.10.0
libtpu: 0.0.40
codegen_flags: <defaults>
</compile_context>

<pallas_src>
import functools

import jax
import jax.numpy as jnp
from jax.experimental import pallas as pl
from jax.experimental.pallas import tpu as pltpu


def _cdiv(a, b):
    return (a + b - 1) // b


def _budgets():
    """(per-tile byte budget, scoped VMEM limit) per TPU generation."""
    tile_bytes, vmem_limit = 6 << 20, 48 << 20      # v7x-safe default (64 MiB VMEM/TC)
    try:
        kind = jax.devices()[0].device_kind.lower()
    except Exception:  # pragma: no cover - defensive, keep conservative default
        kind = ""
    if ("v5" in kind) or ("v6" in kind):            # 128 MiB physical VMEM
        tile_bytes, vmem_limit = 12 << 20, 80 << 20
    return tile_bytes, vmem_limit


# ---------------------------------------------------------------------------
# Small-C kernel: unrolled VPU broadcast-FMAs on sublane/lane-dense tiles.
# ---------------------------------------------------------------------------
def _fma_kernel(w_ref, b_ref, x_ref, o_ref, *, C):
    # w_ref: SMEM (C*C,) row-major w[co, ci];  b_ref: SMEM (C,)
    # x_ref/o_ref: (1, C, rt, 128) VMEM blocks (channels = leading loop dim).
    for co in range(C):
        acc = x_ref[0, 0].astype(jnp.float32) * w_ref[co * C + 0]
        for ci in range(1, C):
            acc = acc + x_ref[0, ci].astype(jnp.float32) * w_ref[co * C + ci]
        y = jnp.maximum(acc + b_ref[co], 0.0)                     # bias + ReLU
        o_ref[0, co] = (x_ref[0, co].astype(jnp.float32) + y).astype(o_ref.dtype)


# ---------------------------------------------------------------------------
# Large-C kernel: pointwise conv == channel matmul on the MXU.
# ---------------------------------------------------------------------------
def _dot_kernel(x_ref, w_ref, b_ref, o_ref):
    # x_ref: (1, C, t) channels on sublanes, spatial on lanes.
    x = x_ref[0].astype(jnp.float32)                              # (C, t)
    y = jnp.dot(w_ref[...], x, preferred_element_type=jnp.float32)
    y = jnp.maximum(y + b_ref[...], 0.0)                          # bias + ReLU
    o_ref[0] = (x + y).astype(o_ref.dtype)                        # skip connection


def skip_connection_block(x_nchw, w, b):
    """x + ReLU(Conv1x1(x)) fused in one Pallas kernel (native NCHW layout).

    x_nchw: (N, C, H, W);  w: (C, C) 1x1-conv weight (out_ch, in_ch);  b: (C,)
    """
    N, C, H, W = x_nchw.shape
    HW = H * W
    itemsize = jnp.dtype(x_nchw.dtype).itemsize
    tile_bytes, vmem_limit = _budgets()

    # -------- small-C, sublane-dense VPU path --------
    if C <= 16 and HW % 128 == 0:
        R = HW // 128
        x4d = x_nchw.reshape(N, C, R, 128)        # free reshape (no HBM transpose)

        # rows-of-128 per tile: fill ~tile_bytes, then shrink for >=8 grid
        # steps (megacore + pipelining), then respect the (8,128) rule on the
        # last two block dims (rt multiple of 8 unless rt == R).
        bytes_per_row = C * 128 * itemsize
        rt = max(1, min(R, tile_bytes // bytes_per_row))
        while N * _cdiv(R, rt) < 8 and rt > 1:
            rt = _cdiv(rt, 2)
        if rt < R:
            rt = min(R, max(8, (rt // 8) * 8)) if R >= 8 else R
        grid = (N, _cdiv(R, rt))

        out4d = pl.pallas_call(
            functools.partial(_fma_kernel, C=C),
            out_shape=jax.ShapeDtypeStruct((N, C, R, 128), x_nchw.dtype),
            grid_spec=pltpu.PrefetchScalarGridSpec(
                num_scalar_prefetch=0,
                grid=grid,
                in_specs=[
                    pl.BlockSpec(memory_space=pltpu.MemorySpace.SMEM),  # w flat (C*C,)
                    pl.BlockSpec(memory_space=pltpu.MemorySpace.SMEM),  # b (C,)
                    pl.BlockSpec((1, C, rt, 128), lambda n, s: (n, 0, s, 0)),
                ],
                out_specs=pl.BlockSpec((1, C, rt, 128), lambda n, s: (n, 0, s, 0)),
            ),
            compiler_params=pltpu.CompilerParams(
                dimension_semantics=("parallel", "parallel"),
                vmem_limit_bytes=vmem_limit,
            ),
        )(w.reshape(C * C), b, x4d)
        return out4d.reshape(N, C, H, W)

    # -------- general / large-C MXU path (also fallback when HW % 128 != 0) --------
    x3d = x_nchw.reshape(N, C, HW)                # free reshape
    b2d = b.reshape(C, 1)
    bytes_per_lane = C * itemsize
    max_lanes = max(128, (tile_bytes // bytes_per_lane) // 128 * 128)
    if HW <= 128:
        t = HW
    else:
        t = min((HW // 128) * 128, max_lanes)
        while N * _cdiv(HW, t) < 8 and t > 128:
            t = max(128, ((t // 2) // 128) * 128)
    grid = (N, _cdiv(HW, t))

    out3d = pl.pallas_call(
        _dot_kernel,
        out_shape=jax.ShapeDtypeStruct((N, C, HW), x3d.dtype),
        grid_spec=pltpu.PrefetchScalarGridSpec(
            num_scalar_prefetch=0,
            grid=grid,
            in_specs=[
                pl.BlockSpec((1, C, t), lambda n, s: (n, 0, s)),   # x tile
                pl.BlockSpec((C, C), lambda n, s: (0, 0)),         # full weight
                pl.BlockSpec((C, 1), lambda n, s: (0, 0)),         # bias column
            ],
            out_specs=pl.BlockSpec((1, C, t), lambda n, s: (n, 0, s)),
        ),
        compiler_params=pltpu.CompilerParams(
            dimension_semantics=("parallel", "parallel"),
            vmem_limit_bytes=vmem_limit,
        ),
    )(x3d, w, b2d)
    return out3d.reshape(N, C, H, W)


if __name__ == "__main__":
    key = jax.random.PRNGKey(0)
    kx, kw, kb = jax.random.split(key, 3)

    N, C, H, W = 2, 4, 16, 16
    x = jax.random.normal(kx, (N, C, H, W), dtype=jnp.float32)

    # Deterministic "conv" parameters (1x1 kernel => (C_out, C_in))
    fan_in = C
    bound = 1.0 / (fan_in ** 0.5)
    w = jax.random.uniform(kw, (C, C), minval=-bound, maxval=bound,
                           dtype=jnp.float32)
    b = jax.random.uniform(kb, (C,), minval=-bound, maxval=bound,
                           dtype=jnp.float32)

    out = skip_connection_block(x, w, b)
    out = jax.block_until_ready(out)

    # Pure-JAX reference of x + ReLU(conv1x1(x)).
    ref = x + jnp.maximum(
        jnp.einsum("nchw,oc->nohw", x, w) + b[None, :, None, None], 0.0)
    assert jnp.allclose(out, ref, atol=1e-5, rtol=1e-5)

    print("KERNEL_OK")
</pallas_src>

<mosaic_0001>
module attributes {stable_mosaic.version = 11 : i64} {
  func.func @_fma_kernel(%arg0: i32, %arg1: i32, %arg2: memref<16xf32, #tpu.memory_space<smem>>, %arg3: memref<4xf32, #tpu.memory_space<smem>>, %arg4: memref<1x4x2x128xf32, #tpu.memory_space<vmem>>, %arg5: memref<1x4x2x128xf32, #tpu.memory_space<vmem>>) attributes {dimension_semantics = [#tpu.dimension_semantics<parallel>, #tpu.dimension_semantics<parallel>], iteration_bounds = array<i64: 2, 1>, scalar_prefetch = 0 : i64, scratch_operands = 0 : i64, tpu.core_type = #tpu.core_type<tc>, window_params = [{transform_indices = @transform_0, window_bounds = array<i64: 16>}, {transform_indices = @transform_1, window_bounds = array<i64: 4>}, {transform_indices = @transform_2, window_bounds = array<i64: 1, 4, 2, 128>}, {transform_indices = @transform_3, window_bounds = array<i64: 1, 4, 2, 128>}]} {
    %c0 = arith.constant 0 : index
    %c0_0 = arith.constant 0 : index
    %c0_1 = arith.constant 0 : index
    %c0_2 = arith.constant 0 : index
    %0 = vector.load %arg4[%c0, %c0_0, %c0_1, %c0_2] : memref<1x4x2x128xf32, #tpu.memory_space<vmem>>, vector<1x1x2x128xf32>
    %1 = vector.shape_cast %0 : vector<1x1x2x128xf32> to vector<2x128xf32>
    %c0_3 = arith.constant 0 : index
    %2 = memref.load %arg2[%c0_3] : memref<16xf32, #tpu.memory_space<smem>>
    %3 = vector.broadcast %2 : f32 to vector<2x128xf32>
    %4 = arith.mulf %1, %3 : vector<2x128xf32>
    %c0_4 = arith.constant 0 : index
    %c1 = arith.constant 1 : index
    %c0_5 = arith.constant 0 : index
    %c0_6 = arith.constant 0 : index
    %5 = vector.load %arg4[%c0_4, %c1, %c0_5, %c0_6] : memref<1x4x2x128xf32, #tpu.memory_space<vmem>>, vector<1x1x2x128xf32>
    %6 = vector.shape_cast %5 : vector<1x1x2x128xf32> to vector<2x128xf32>
    %c1_7 = arith.constant 1 : index
    %7 = memref.load %arg2[%c1_7] : memref<16xf32, #tpu.memory_space<smem>>
    %8 = vector.broadcast %7 : f32 to vector<2x128xf32>
    %9 = arith.mulf %6, %8 : vector<2x128xf32>
    %10 = arith.addf %4, %9 : vector<2x128xf32>
    %c0_8 = arith.constant 0 : index
    %c2 = arith.constant 2 : index
    %c0_9 = arith.constant 0 : index
    %c0_10 = arith.constant 0 : index
    %11 = vector.load %arg4[%c0_8, %c2, %c0_9, %c0_10] : memref<1x4x2x128xf32, #tpu.memory_space<vmem>>, vector<1x1x2x128xf32>
    %12 = vector.shape_cast %11 : vector<1x1x2x128xf32> to vector<2x128xf32>
    %c2_11 = arith.constant 2 : index
    %13 = memref.load %arg2[%c2_11] : memref<16xf32, #tpu.memory_space<smem>>
    %14 = vector.broadcast %13 : f32 to vector<2x128xf32>
    %15 = arith.mulf %12, %14 : vector<2x128xf32>
    %16 = arith.addf %10, %15 : vector<2x128xf32>
    %c0_12 = arith.constant 0 : index
    %c3 = arith.constant 3 : index
    %c0_13 = arith.constant 0 : index
    %c0_14 = arith.constant 0 : index
    %17 = vector.load %arg4[%c0_12, %c3, %c0_13, %c0_14] : memref<1x4x2x128xf32, #tpu.memory_space<vmem>>, vector<1x1x2x128xf32>
    %18 = vector.shape_cast %17 : vector<1x1x2x128xf32> to vector<2x128xf32>
    %c3_15 = arith.constant 3 : index
    %19 = memref.load %arg2[%c3_15] : memref<16xf32, #tpu.memory_space<smem>>
    %20 = vector.broadcast %19 : f32 to vector<2x128xf32>
    %21 = arith.mulf %18, %20 : vector<2x128xf32>
    %22 = arith.addf %16, %21 : vector<2x128xf32>
    %c0_16 = arith.constant 0 : index
    %23 = memref.load %arg3[%c0_16] : memref<4xf32, #tpu.memory_space<smem>>
    %24 = vector.broadcast %23 : f32 to vector<2x128xf32>
    %25 = arith.addf %22, %24 : vector<2x128xf32>
    %cst = arith.constant 0.000000e+00 : f32
    %26 = vector.broadcast %cst : f32 to vector<2x128xf32>
    %27 = arith.maximumf %25, %26 : vector<2x128xf32>
    %c0_17 = arith.constant 0 : index
    %c0_18 = arith.constant 0 : index
    %c0_19 = arith.constant 0 : index
    %c0_20 = arith.constant 0 : index
    %28 = vector.load %arg4[%c0_17, %c0_18, %c0_19, %c0_20] : memref<1x4x2x128xf32, #tpu.memory_space<vmem>>, vector<1x1x2x128xf32>
    %29 = vector.shape_cast %28 : vector<1x1x2x128xf32> to vector<2x128xf32>
    %30 = arith.addf %29, %27 : vector<2x128xf32>
    %c0_21 = arith.constant 0 : index
    %c0_22 = arith.constant 0 : index
    %c0_23 = arith.constant 0 : index
    %c0_24 = arith.constant 0 : index
    %31 = vector.load %arg5[%c0_21, %c0_22, %c0_23, %c0_24] : memref<1x4x2x128xf32, #tpu.memory_space<vmem>>, vector<1x1x2x128xf32>
    %32 = vector.shape_cast %31 : vector<1x1x2x128xf32> to vector<2x128xf32>
    %33 = vector.shape_cast %30 : vector<2x128xf32> to vector<1x1x2x128xf32>
    tpu.vector_store %arg5[%c0_21, %c0_22, %c0_23, %c0_24], %33 {strides = array<i32>} : memref<1x4x2x128xf32, #tpu.memory_space<vmem>>, vector<1x1x2x128xf32>,
    %c0_25 = arith.constant 0 : index
    %c0_26 = arith.constant 0 : index
    %c0_27 = arith.constant 0 : index
    %c0_28 = arith.constant 0 : index
    %34 = vector.load %arg4[%c0_25, %c0_26, %c0_27, %c0_28] : memref<1x4x2x128xf32, #tpu.memory_space<vmem>>, vector<1x1x2x128xf32>
    %35 = vector.shape_cast %34 : vector<1x1x2x128xf32> to vector<2x128xf32>
    %c4 = arith.constant 4 : index
    %36 = memref.load %arg2[%c4] : memref<16xf32, #tpu.memory_space<smem>>
    %37 = vector.broadcast %36 : f32 to vector<2x128xf32>
    %38 = arith.mulf %35, %37 : vector<2x128xf32>
    %c0_29 = arith.constant 0 : index
    %c1_30 = arith.constant 1 : index
    %c0_31 = arith.constant 0 : index
    %c0_32 = arith.constant 0 : index
    %39 = vector.load %arg4[%c0_29, %c1_30, %c0_31, %c0_32] : memref<1x4x2x128xf32, #tpu.memory_space<vmem>>, vector<1x1x2x128xf32>
    %40 = vector.shape_cast %39 : vector<1x1x2x128xf32> to vector<2x128xf32>
    %c5 = arith.constant 5 : index
    %41 = memref.load %arg2[%c5] : memref<16xf32, #tpu.memory_space<smem>>
    %42 = vector.broadcast %41 : f32 to vector<2x128xf32>
    %43 = arith.mulf %40, %42 : vector<2x128xf32>
    %44 = arith.addf %38, %43 : vector<2x128xf32>
    %c0_33 = arith.constant 0 : index
    %c2_34 = arith.constant 2 : index
    %c0_35 = arith.constant 0 : index
    %c0_36 = arith.constant 0 : index
    %45 = vector.load %arg4[%c0_33, %c2_34, %c0_35, %c0_36] : memref<1x4x2x128xf32, #tpu.memory_space<vmem>>, vector<1x1x2x128xf32>
    %46 = vector.shape_cast %45 : vector<1x1x2x128xf32> to vector<2x128xf32>
    %c6 = arith.constant 6 : index
    %47 = memref.load %arg2[%c6] : memref<16xf32, #tpu.memory_space<smem>>
    %48 = vector.broadcast %47 : f32 to vector<2x128xf32>
    %49 = arith.mulf %46, %48 : vector<2x128xf32>
    %50 = arith.addf %44, %49 : vector<2x128xf32>
    %c0_37 = arith.constant 0 : index
    %c3_38 = arith.constant 3 : index
    %c0_39 = arith.constant 0 : index
    %c0_40 = arith.constant 0 : index
    %51 = vector.load %arg4[%c0_37, %c3_38, %c0_39, %c0_40] : memref<1x4x2x128xf32, #tpu.memory_space<vmem>>, vector<1x1x2x128xf32>
    %52 = vector.shape_cast %51 : vector<1x1x2x128xf32> to vector<2x128xf32>
    %c7 = arith.constant 7 : index
    %53 = memref.load %arg2[%c7] : memref<16xf32, #tpu.memory_space<smem>>
    %54 = vector.broadcast %53 : f32 to vector<2x128xf32>
    %55 = arith.mulf %52, %54 : vector<2x128xf32>
    %56 = arith.addf %50, %55 : vector<2x128xf32>
    %c1_41 = arith.constant 1 : index
    %57 = memref.load %arg3[%c1_41] : memref<4xf32, #tpu.memory_space<smem>>
    %58 = vector.broadcast %57 : f32 to vector<2x128xf32>
    %59 = arith.addf %56, %58 : vector<2x128xf32>
    %cst_42 = arith.constant 0.000000e+00 : f32
    %60 = vector.broadcast %cst_42 : f32 to vector<2x128xf32>
    %61 = arith.maximumf %59, %60 : vector<2x128xf32>
    %c0_43 = arith.constant 0 : index
    %c1_44 = arith.constant 1 : index
    %c0_45 = arith.constant 0 : index
    %c0_46 = arith.constant 0 : index
    %62 = vector.load %arg4[%c0_43, %c1_44, %c0_45, %c0_46] : memref<1x4x2x128xf32, #tpu.memory_space<vmem>>, vector<1x1x2x128xf32>
    %63 = vector.shape_cast %62 : vector<1x1x2x128xf32> to vector<2x128xf32>
    %64 = arith.addf %63, %61 : vector<2x128xf32>
    %c0_47 = arith.constant 0 : index
    %c1_48 = arith.constant 1 : index
    %c0_49 = arith.constant 0 : index
    %c0_50 = arith.constant 0 : index
    %65 = vector.load %arg5[%c0_47, %c1_48, %c0_49, %c0_50] : memref<1x4x2x128xf32, #tpu.memory_space<vmem>>, vector<1x1x2x128xf32>
    %66 = vector.shape_cast %65 : vector<1x1x2x128xf32> to vector<2x128xf32>
    %67 = vector.shape_cast %64 : vector<2x128xf32> to vector<1x1x2x128xf32>
    tpu.vector_store %arg5[%c0_47, %c1_48, %c0_49, %c0_50], %67 {strides = array<i32>} : memref<1x4x2x128xf32, #tpu.memory_space<vmem>>, vector<1x1x2x128xf32>,
    %c0_51 = arith.constant 0 : index
    %c0_52 = arith.constant 0 : index
    %c0_53 = arith.constant 0 : index
    %c0_54 = arith.constant 0 : index
    %68 = vector.load %arg4[%c0_51, %c0_52, %c0_53, %c0_54] : memref<1x4x2x128xf32, #tpu.memory_space<vmem>>, vector<1x1x2x128xf32>
    %69 = vector.shape_cast %68 : vector<1x1x2x128xf32> to vector<2x128xf32>
    %c8 = arith.constant 8 : index
    %70 = memref.load %arg2[%c8] : memref<16xf32, #tpu.memory_space<smem>>
    %71 = vector.broadcast %70 : f32 to vector<2x128xf32>
    %72 = arith.mulf %69, %71 : vector<2x128xf32>
    %c0_55 = arith.constant 0 : index
    %c1_56 = arith.constant 1 : index
    %c0_57 = arith.constant 0 : index
    %c0_58 = arith.constant 0 : index
    %73 = vector.load %arg4[%c0_55, %c1_56, %c0_57, %c0_58] : memref<1x4x2x128xf32, #tpu.memory_space<vmem>>, vector<1x1x2x128xf32>
    %74 = vector.shape_cast %73 : vector<1x1x2x128xf32> to vector<2x128xf32>
    %c9 = arith.constant 9 : index
    %75 = memref.load %arg2[%c9] : memref<16xf32, #tpu.memory_space<smem>>
    %76 = vector.broadcast %75 : f32 to vector<2x128xf32>
    %77 = arith.mulf %74, %76 : vector<2x128xf32>
    %78 = arith.addf %72, %77 : vector<2x128xf32>
    %c0_59 = arith.constant 0 : index
    %c2_60 = arith.constant 2 : index
    %c0_61 = arith.constant 0 : index
    %c0_62 = arith.constant 0 : index
    %79 = vector.load %arg4[%c0_59, %c2_60, %c0_61, %c0_62] : memref<1x4x2x128xf32, #tpu.memory_space<vmem>>, vector<1x1x2x128xf32>
    %80 = vector.shape_cast %79 : vector<1x1x2x128xf32> to vector<2x128xf32>
    %c10 = arith.constant 10 : index
    %81 = memref.load %arg2[%c10] : memref<16xf32, #tpu.memory_space<smem>>
    %82 = vector.broadcast %81 : f32 to vector<2x128xf32>
    %83 = arith.mulf %80, %82 : vector<2x128xf32>
    %84 = arith.addf %78, %83 : vector<2x128xf32>
    %c0_63 = arith.constant 0 : index
    %c3_64 = arith.constant 3 : index
    %c0_65 = arith.constant 0 : index
    %c0_66 = arith.constant 0 : index
    %85 = vector.load %arg4[%c0_63, %c3_64, %c0_65, %c0_66] : memref<1x4x2x128xf32, #tpu.memory_space<vmem>>, vector<1x1x2x128xf32>
    %86 = vector.shape_cast %85 : vector<1x1x2x128xf32> to vector<2x128xf32>
    %c11 = arith.constant 11 : index
    %87 = memref.load %arg2[%c11] : memref<16xf32, #tpu.memory_space<smem>>
    %88 = vector.broadcast %87 : f32 to vector<2x128xf32>
    %89 = arith.mulf %86, %88 : vector<2x128xf32>
    %90 = arith.addf %84, %89 : vector<2x128xf32>
    %c2_67 = arith.constant 2 : index
    %91 = memref.load %arg3[%c2_67] : memref<4xf32, #tpu.memory_space<smem>>
    %92 = vector.broadcast %91 : f32 to vector<2x128xf32>
    %93 = arith.addf %90, %92 : vector<2x128xf32>
    %cst_68 = arith.constant 0.000000e+00 : f32
    %94 = vector.broadcast %cst_68 : f32 to vector<2x128xf32>
    %95 = arith.maximumf %93, %94 : vector<2x128xf32>
    %c0_69 = arith.constant 0 : index
    %c2_70 = arith.constant 2 : index
    %c0_71 = arith.constant 0 : index
    %c0_72 = arith.constant 0 : index
    %96 = vector.load %arg4[%c0_69, %c2_70, %c0_71, %c0_72] : memref<1x4x2x128xf32, #tpu.memory_space<vmem>>, vector<1x1x2x128xf32>
    %97 = vector.shape_cast %96 : vector<1x1x2x128xf32> to vector<2x128xf32>
    %98 = arith.addf %97, %95 : vector<2x128xf32>
    %c0_73 = arith.constant 0 : index
    %c2_74 = arith.constant 2 : index
    %c0_75 = arith.constant 0 : index
    %c0_76 = arith.constant 0 : index
    %99 = vector.load %arg5[%c0_73, %c2_74, %c0_75, %c0_76] : memref<1x4x2x128xf32, #tpu.memory_space<vmem>>, vector<1x1x2x128xf32>
    %100 = vector.shape_cast %99 : vector<1x1x2x128xf32> to vector<2x128xf32>
    %101 = vector.shape_cast %98 : vector<2x128xf32> to vector<1x1x2x128xf32>
    tpu.vector_store %arg5[%c0_73, %c2_74, %c0_75, %c0_76], %101 {strides = array<i32>} : memref<1x4x2x128xf32, #tpu.memory_space<vmem>>, vector<1x1x2x128xf32>,
    %c0_77 = arith.constant 0 : index
    %c0_78 = arith.constant 0 : index
    %c0_79 = arith.constant 0 : index
    %c0_80 = arith.constant 0 : index
    %102 = vector.load %arg4[%c0_77, %c0_78, %c0_79, %c0_80] : memref<1x4x2x128xf32, #tpu.memory_space<vmem>>, vector<1x1x2x128xf32>
    %103 = vector.shape_cast %102 : vector<1x1x2x128xf32> to vector<2x128xf32>
    %c12 = arith.constant 12 : index
    %104 = memref.load %arg2[%c12] : memref<16xf32, #tpu.memory_space<smem>>
    %105 = vector.broadcast %104 : f32 to vector<2x128xf32>
    %106 = arith.mulf %103, %105 : vector<2x128xf32>
    %c0_81 = arith.constant 0 : index
    %c1_82 = arith.constant 1 : index
    %c0_83 = arith.constant 0 : index
    %c0_84 = arith.constant 0 : index
    %107 = vector.load %arg4[%c0_81, %c1_82, %c0_83, %c0_84] : memref<1x4x2x128xf32, #tpu.memory_space<vmem>>, vector<1x1x2x128xf32>
    %108 = vector.shape_cast %107 : vector<1x1x2x128xf32> to vector<2x128xf32>
    %c13 = arith.constant 13 : index
    %109 = memref.load %arg2[%c13] : memref<16xf32, #tpu.memory_space<smem>>
    %110 = vector.broadcast %109 : f32 to vector<2x128xf32>
    %111 = arith.mulf %108, %110 : vector<2x128xf32>
    %112 = arith.addf %106, %111 : vector<2x128xf32>
    %c0_85 = arith.constant 0 : index
    %c2_86 = arith.constant 2 : index
    %c0_87 = arith.constant 0 : index
    %c0_88 = arith.constant 0 : index
    %113 = vector.load %arg4[%c0_85, %c2_86, %c0_87, %c0_88] : memref<1x4x2x128xf32, #tpu.memory_space<vmem>>, vector<1x1x2x128xf32>
    %114 = vector.shape_cast %113 : vector<1x1x2x128xf32> to vector<2x128xf32>
    %c14 = arith.constant 14 : index
    %115 = memref.load %arg2[%c14] : memref<16xf32, #tpu.memory_space<smem>>
    %116 = vector.broadcast %115 : f32 to vector<2x128xf32>
    %117 = arith.mulf %114, %116 : vector<2x128xf32>
    %118 = arith.addf %112, %117 : vector<2x128xf32>
    %c0_89 = arith.constant 0 : index
    %c3_90 = arith.constant 3 : index
    %c0_91 = arith.constant 0 : index
    %c0_92 = arith.constant 0 : index
    %119 = vector.load %arg4[%c0_89, %c3_90, %c0_91, %c0_92] : memref<1x4x2x128xf32, #tpu.memory_space<vmem>>, vector<1x1x2x128xf32>
    %120 = vector.shape_cast %119 : vector<1x1x2x128xf32> to vector<2x128xf32>
    %c15 = arith.constant 15 : index
    %121 = memref.load %arg2[%c15] : memref<16xf32, #tpu.memory_space<smem>>
    %122 = vector.broadcast %121 : f32 to vector<2x128xf32>
    %123 = arith.mulf %120, %122 : vector<2x128xf32>
    %124 = arith.addf %118, %123 : vector<2x128xf32>
    %c3_93 = arith.constant 3 : index
    %125 = memref.load %arg3[%c3_93] : memref<4xf32, #tpu.memory_space<smem>>
    %126 = vector.broadcast %125 : f32 to vector<2x128xf32>
    %127 = arith.addf %124, %126 : vector<2x128xf32>
    %cst_94 = arith.constant 0.000000e+00 : f32
    %128 = vector.broadcast %cst_94 : f32 to vector<2x128xf32>
    %129 = arith.maximumf %127, %128 : vector<2x128xf32>
    %c0_95 = arith.constant 0 : index
    %c3_96 = arith.constant 3 : index
    %c0_97 = arith.constant 0 : index
    %c0_98 = arith.constant 0 : index
    %130 = vector.load %arg4[%c0_95, %c3_96, %c0_97, %c0_98] : memref<1x4x2x128xf32, #tpu.memory_space<vmem>>, vector<1x1x2x128xf32>
    %131 = vector.shape_cast %130 : vector<1x1x2x128xf32> to vector<2x128xf32>
    %132 = arith.addf %131, %129 : vector<2x128xf32>
    %c0_99 = arith.constant 0 : index
    %c3_100 = arith.constant 3 : index
    %c0_101 = arith.constant 0 : index
    %c0_102 = arith.constant 0 : index
    %133 = vector.load %arg5[%c0_99, %c3_100, %c0_101, %c0_102] : memref<1x4x2x128xf32, #tpu.memory_space<vmem>>, vector<1x1x2x128xf32>
    %134 = vector.shape_cast %133 : vector<1x1x2x128xf32> to vector<2x128xf32>
    %135 = vector.shape_cast %132 : vector<2x128xf32> to vector<1x1x2x128xf32>
    tpu.vector_store %arg5[%c0_99, %c3_100, %c0_101, %c0_102], %135 {strides = array<i32>} : memref<1x4x2x128xf32, #tpu.memory_space<vmem>>, vector<1x1x2x128xf32>,
    return
  }
  func.func @transform_0(%arg0: i32, %arg1: i32) -> i32 {
    %c0_i32 = arith.constant 0 : i32
    %c0_i32_0 = arith.constant 0 : i32
    return %c0_i32 : i32
  }
  func.func @transform_1(%arg0: i32, %arg1: i32) -> i32 {
    %c0_i32 = arith.constant 0 : i32
    %c0_i32_0 = arith.constant 0 : i32
    return %c0_i32 : i32
  }
  func.func @transform_2(%arg0: i32, %arg1: i32) -> (i32, i32, i32, i32) {
    %c0_i32 = arith.constant 0 : i32
    %c0_i32_0 = arith.constant 0 : i32
    %c0_i32_1 = arith.constant 0 : i32
    return %arg0, %c0_i32, %arg1, %c0_i32_0 : i32, i32, i32, i32
  }
  func.func @transform_3(%arg0: i32, %arg1: i32) -> (i32, i32, i32, i32) {
    %c0_i32 = arith.constant 0 : i32
    %c0_i32_0 = arith.constant 0 : i32
    %c0_i32_1 = arith.constant 0 : i32
    return %arg0, %c0_i32, %arg1, %c0_i32_0 : i32, i32, i32, i32
  }
}

</mosaic_0001>

<bundles_post_ra>
// kernel: tpu_custom_call.1
= control target key start
LH: loop header
LB: loop body
LE: loop exit
PB: predicated region body
PF: predicated region fallthrough
CT: control target
= control target key end

     0   :  { %8 = vsyncpa [#allocation5], 0  ;;  %s1077_s0 = inlined_call_operand.hbm [shape: f32[16], index: 0, kind: input, shape index: {}]   ;;  %s1078_s1 = inlined_call_operand.vmem [shape: f32[4], index: 1, kind: input, shape index: {}]   ;;  %s1079_s2 = inlined_call_operand.hbm [shape: f32[2,4,2,128], index: 2, kind: input, shape index: {}]   ;;  %s1080_s3 = inlined_call_operand.hbm [shape: f32[2,4,2,128], index: 3, kind: output, shape index: {}]  }
   0x1   :  { %9 = vsyncpa [#allocation6], 0 }
   0x2   :  { %10 = vsyncpa [#allocation3], 0 }
   0x3   :  { %12 = vsyncpa [#allocation3 + $0x1], 0 }
   0x4   :  { %13 = vsyncpa [#allocation4], 0 }
   0x5   :  { %15 = vsyncpa [#allocation4 + $0x1], 0  ;;  %s780_s12 = smov 0   ;;  %s782_s13 = smov 0  }
   0x6   :  { %s784_s14 = smov 0   ;;  %s786_s15 = smov 0  }
   0x7   :  { %s788_s16 = smov 0   ;;  %s790_s17 = smov 0  }
   0x8 LB: > { %s461_s18 = sadd.s32 4294967295, %s750_s17   ;;  %s462_s19 = sadd.s32 4294967294, %s750_s17   ;;  %s750_s17 = sphi %s790_s17, %s21_s17   ;;  %s746_s16 = sphi %s788_s16, %s1101_s16   ;;  %s742_s15 = sphi %s786_s15, %s1100_s15   ;;  %s738_s14 = sphi %s784_s14, %s1099_s14   ;;  %s734_s13 = sphi %s782_s13, %s1098_s13   ;;  %s730_s12 = sphi %s780_s12, %s1097_s12  }
   0x9   : > { %s84_s20 = sadd.s32 1, %s738_s14  ;;  %p91_p0 = scmp.ne.s32.totalorder %s738_s14, %s734_s13 }
   0xa   : > { %p92_p1 = scmp.eq.s32.totalorder %s750_s17, 0  ;;  %p97_p2 = scmp.ne.s32.totalorder %s734_s13, %s730_s12 }
   0xb   : > { %p818_p3 = scmp.eq.s32.totalorder %s461_s18, 0  ;;  %p123_p4 = scmp.eq.s32.totalorder %s461_s18, 1 }
   0xc   : > { %p93_p5 = por %p92_p1, %p91_p0  ;;  %p129_p6 = scmp.eq.s32.totalorder %s462_s19, 1 }
   0xd   : > { %s1085_s21 = scalar_select %p818_p3, 1, 0 }
   0xe   : > { %p824_p7 = por %p818_p3, %p97_p2  ;;  %p828_p8 = por %p123_p4, %p91_p0 }
   0xf   : > { %p832_p9 = por %p129_p6, %p97_p2  ;;  %p463_p10 = scmp.ge.s32.totalorder %s750_s17, 1 }
  0x10   : > { %s1086_s22 = scalar_select %p824_p7, 1, 0 }
  0x11   : > { %s1087_s23 = scalar_select %p828_p8, 1, 0 }
  0x12   : > { %s1088_s24 = scalar_select %p832_p9, 1, 0 }
  0x13   : > { %p136_p11 = scmp.lt.s32.totalorder %s750_s17, 3  ;;  %p544_p1 = scmp.lt.s32.totalorder %s750_s17, 2 }
  0x14   : > { %s158_s28 = sshll.u32 %s1078_s1, 4  ;;  %s169_s4 = sand.u32 1, %s738_s14   ;;  %s159_s28 = int_to_ptr.vmem [resolvable:$true] %s158_s28 }
  0x15   : > { %p839_p13 = pnand %p463_p10, %p136_p11  ;;  %p849_p4 = pnand %p544_p1, %p93_p5 }
  0x16   : > { %s33_s5 = sadd.s32 1, %s746_s16  ;;  %s602_s8 = scalar_lea.hbm %s1077_s0, 16 }
  0x17   : > { %p527_p0 = pneg %p839_p13  ;;  %p603_p5 = scmp.ne.s32.totalorder %s1077_s0, %s602_s8 }
  0x18   : > { %p609_p1 = scmp.lt.u32.totalorder %s602_s8, %s1077_s0 }
  0x19   : > { %p855_p2 = pnand %p527_p0, %p818_p3 }
  0x1b   : > { %p604_p6 = pneg %p855_p2 }
  0x1d   : > { %p605_p10 = pnand %p604_p6, %p603_p5 }
  0x1f   : > { %p606_p11 = pneg %p605_p10 }
  0x21   : > { %p611_p0 = pnand %p609_p1, %p606_p11 }
  0x23   : > { %614 = shalt.err (!%p611_p0)
}
  0x24   : > { %s752_s19 = smov [#allocation2]   ;;  %s615_s6 = scalar_lea.vmem %s159_s28, 16 }
  0x25   : > { %530 = dma.hbm_to_smem (!%p855_p2), %s1077_s0, 16, %s752_s19, [#allocation5]  }
  0x26   : > { %p616_p12 = scmp.ne.s32.totalorder %s159_s28, %s615_s6  ;;  %p623_p7 = scmp.lt.s32.totalorder %s159_s28, %s159_s28 }
  0x27   : > { %p624_p5 = scmp.lt.s32.totalorder %s615_s6, %s615_s6 }
  0x28   : > { %p618_p9 = pnand %p616_p12, %p604_p6 }
  0x29   : > { %p625_p10 = por %p624_p5, %p623_p7 }
  0x2a   : > { %p619_p8 = pneg %p618_p9 }
  0x2c   : > { %p626_p3 = pnand %p625_p10, %p619_p8 }
  0x2e   : > { %629 = shalt.err (!%p626_p3)
}
  0x2f   : > { %s753_s7 = smov [#allocation7]   ;;  %p35_p11 = scmp.ge.s32.totalorder %s33_s5, 2 }
  0x30   : > { %533 = dma.vmem_to_smem (!%p855_p2), %s159_s28, 16, %s753_s7, [#allocation6]  }
  0x31   : > { %s467_s8 = sshll.u32 %s169_s4, 3  ;;  %s513_s9 = sshll.u32 %s746_s16, 7 }
  0x32   : > { %s1103_s5 = smov (%p35_p11, %s33_s5), 0  ;;  %s887_s30 = scalar_lea.hbm %s1079_s2, %s513_s9 }
  0x33   : > { %s79_s18 = ssub.s32 %s746_s16, %s1103_s5  ;;  %s173_s19 = scalar_lea.vmem [#allocation8], %s467_s8 }
  0x34   : > { %s181_s28 = sshll.u32 %s173_s19, 4  ;;  %p82_p3 = scmp.eq.s32.totalorder %s79_s18, 0  ;;  %s891_s28 = int_to_ptr.vmem [resolvable:$true] %s181_s28 }
  0x35   : > { %s900_s27 = scalar_lea.sflag [#allocation3], %s169_s4  ;;  %s630_s6 = scalar_lea.hbm %s887_s30, 128 }
  0x36   : > { %s896_s26 = scalar_select %p82_p3, %s738_s14, %s84_s20  }
  0x37   : > { %p631_p7 = scmp.ne.s32.totalorder %s887_s30, %s630_s6  ;;  %p632_p8 = pneg %p849_p4 }
  0x38   : > { %s635_s9 = scalar_lea.hbm %s1079_s2, 256  ;;  %p636_p2 = scmp.lt.u32.totalorder %s887_s30, %s1079_s2 }
  0x39   : > { %p633_p9 = pnand %p632_p8, %p631_p7  ;;  %p637_p6 = scmp.lt.u32.totalorder %s635_s9, %s630_s6 }
  0x3a   : > { %p639_p0 = scmp.lt.u32.totalorder %s630_s6, %s887_s30 }
  0x3b   : > { %p634_p12 = pneg %p633_p9  ;;  %p638_p1 = por %p637_p6, %p636_p2 }
  0x3d   : > { %p640_p5 = por %p639_p0, %p638_p1 }
  0x3f   : > { %p641_p10 = pnand %p640_p5, %p634_p12 }
  0x41   : > { %644 = shalt.err (!%p641_p10)
}
  0x42   : > { %s645_s20 = scalar_lea.vmem %s891_s28, 128  ;;  %s754_s4 = smov [#allocation8]  }
  0x43   : > { %p646_p11 = scmp.ne.s32.totalorder %s891_s28, %s645_s20  ;;  %s650_s18 = sshll.u32 %s754_s4, 4  ;;  %s651_s18 = int_to_ptr.vmem [resolvable:$false] %s650_s18 }
  0x44   : > { %s652_s19 = scalar_lea.vmem %s651_s18, 256  ;;  %p653_p9 = scmp.lt.s32.totalorder %s891_s28, %s651_s18 }
  0x45   : > { %p648_p3 = pnand %p646_p11, %p632_p8  ;;  %p654_p2 = scmp.lt.s32.totalorder %s652_s19, %s645_s20 }
  0x47   : > { %p649_p7 = pneg %p648_p3  ;;  %p655_p6 = por %p654_p2, %p653_p9 }
  0x49   : > { %p656_p1 = pnand %p655_p6, %p649_p7 }
  0x4b   : > { %659 = shalt.err (!%p656_p1)
}
  0x4c   : > { %s755_s6 = smov 32   ;;  %s756_s7 = smov 2  }
  0x4d   : > { %537 = dma.hbm_to_vmem [thread:$0]  (!%p849_p4), %s887_s30, 128, %s891_s28, %s900_s27, %s755_s6, %s755_s6, %s756_s7  }
  0x4e   : > { %193 = sbr.rel (%p839_p13) target bundleno = 139 (0x8b), region = 32  ;;  %p1092_p8 = scmp.ne.s32.totalorder (!%p839_p13), %s1085_s21, 0 }
  0x55   : > { %713 = dma.done.wait (%p1092_p8), [#allocation5], 16  }
  0x56   : > { %715 = vsyncadd (%p1092_p8), [#allocation5], 4294967280 }
  0x57   : > { %717 = dma.done.wait (%p1092_p8), [#allocation6], 16  }
  0x58   : > { %719 = vsyncadd (%p1092_p8), [#allocation6], 4294967280  ;;  %s939_s8 = sand.u32 1, %s734_s13   ;;  %p1093_p13 = scmp.ne.s32.totalorder %s1086_s22, 0 }
  0x59   : > { %s473_s25 = sshll.u32 %s939_s8, 3  ;;  %s204_s29 = scalar_lea.sflag [#allocation3], %s939_s8 }
  0x5a   : > { %s945_s30 = scalar_lea.vmem [#allocation8], %s473_s25 }
  0x5b   : > { %721 = dma.done.wait (%p1093_p13), %s204_s29, 128  }
  0x5c   : > { %723 = vsyncadd (%p1093_p13), %s204_s29, 4294967168 }
  0x5d   : > { %212 = sfence }
  0x5e   : > { %s232_s21 = sld [smem:[#allocation2]]  ;;  %s476_s28 = sld [smem:[#allocation2 + $0x1]]  ;;  %v952_v0 = vld [vmem:[%s945_s30] sm:$0x3]  ;;  %v475_v1 = vld [vmem:[%s945_s30 + $0x2] sm:$0x3] }
  0x5f   : > { %s478_s27 = sld [smem:[#allocation2 + $0x2]]  ;;  %s480_s9 = sld [smem:[#allocation2 + $0x3]]  ;;  %v477_v3 = vld [vmem:[%s945_s30 + $0x4] sm:$0x3]  ;;  %v479_v6 = vld [vmem:[%s945_s30 + $0x6] sm:$0x3] }
  0x60   : > { %s954_s10 = sld [smem:[#allocation7]]  ;;  %s481_s11 = sld [smem:[#allocation2 + $0x4]]  ;;  %v259_v10 = vld [vmem:[%s945_s30] sm:$0x3]  ;;  %v974_v11 = vld [vmem:[%s945_s30 + $0x2] sm:$0x3] }
  0x61   : > { %s957_s20 = sld [smem:[#allocation2 + $0x5]]  ;;  %s959_s22 = sld [smem:[#allocation2 + $0x6]]  ;;  %v484_v13 = vld [vmem:[%s945_s30 + $0x4] sm:$0x3]  ;;  %v486_v14 = vld [vmem:[%s945_s30 + $0x6] sm:$0x3] }
  0x62   : > { %s962_s4 = sld [smem:[#allocation2 + $0x7]]  ;;  %s964_s18 = sld [smem:[#allocation7 + $0x1]]  ;;  %v285_v18 = vld [vmem:[%s945_s30] sm:$0x3]  ;;  %v491_v22 = vld [vmem:[%s945_s30 + $0x2] sm:$0x3] }
  0x63   : > { %s968_s19 = sld [smem:[#allocation2 + $0x8]]  ;;  %s970_s6 = sld [smem:[#allocation2 + $0x9]]  ;;  %v493_v31 = vld [vmem:[%s945_s30 + $0x4] sm:$0x3]  ;;  %v495_v36 = vld [vmem:[%s945_s30 + $0x6] sm:$0x3] }
  0x64   : > { %v233_v2 = vstv %s232_s21  ;;  %v238_v5 = vstv %s476_s28  ;;  %s976_s7 = sld [smem:[#allocation2 + $0xa]]  ;;  %s980_s29 = sld [smem:[#allocation2 + $0xb]]  ;;  %v311_v40 = vld [vmem:[%s945_s30] sm:$0x3]  ;;  %v500_v45 = vld [vmem:[%s945_s30 + $0x2] sm:$0x3] }
  0x65   : > { %v234_v4 = vmul.f32 %v233_v2, %v952_v0  ;;  %v239_v7 = vmul.f32 %v475_v1, %v238_v5  ;;  %v244_v8 = vstv %s478_s27  ;;  %v250_v9 = vstv %s480_s9  ;;  %s983_s21 = sld [smem:[#allocation2 + $0xc]]  ;;  %s985_s28 = sld [smem:[#allocation2 + $0xd]]  ;;  %v502_v46 = vld [vmem:[%s945_s30 + $0x4] sm:$0x3]  ;;  %v504_v55 = vld [vmem:[%s945_s30 + $0x6] sm:$0x3] }
  0x66   : > { %v245_v12 = vmul.f32 %v477_v3, %v244_v8  ;;  %v251_v16 = vmul.f32 %v479_v6, %v250_v9  ;;  %v261_v17 = vstv %s481_s11  ;;  %s990_s27 = sld [smem:[#allocation7 + $0x2]]  ;;  %s992_s9 = sld [smem:[#allocation2 + $0xe]]  ;;  %v254_v27 = vstv %s954_s10 }
  0x67   : > { %v240_v15 = vadd.f32 %v239_v7, %v234_v4  ;;  %v262_v19 = vmul.f32 %v261_v17, %v259_v10  ;;  %v265_v20 = vstv %s957_s20  ;;  %v270_v21 = vstv %s959_s22  ;;  %s996_s11 = sld [smem:[#allocation2 + $0xf]]  ;;  %s1009_s10 = sld [smem:[#allocation7 + $0x3]] }
  0x68   : > { %v266_v24 = vmul.f32 %v974_v11, %v265_v20  ;;  %v271_v25 = vmul.f32 %v484_v13, %v270_v21  ;;  %v275_v26 = vstv %s962_s4  ;;  %v279_v37 = vstv %s964_s18  ;;  %s230_s20 = scalar_lea.vmem [#allocation9], %s473_s25  ;;  %s514_s22 = sshll.u32 %s742_s15, 7 }
  0x69   : > { %v246_v23 = vadd.f32 %v245_v12, %v240_v15  ;;  %v276_v28 = vmul.f32 %v486_v14, %v275_v26  ;;  %v287_v29 = vstv %s968_s19  ;;  %v291_v30 = vstv %s970_s6  ;;  %s352_s30 = sshll.u32 %s230_s20, 4  ;;  %s1028_s18 = scalar_lea.hbm %s1080_s3, %s514_s22  ;;  %s1023_s30 = int_to_ptr.vmem [resolvable:$true] %s352_s30 }
  0x6a   : > { %v267_v33 = vadd.f32 %v266_v24, %v262_v19  ;;  %v288_v34 = vmul.f32 %v287_v29, %v285_v18  ;;  %v292_v35 = vmul.f32 %v491_v22, %v291_v30  ;;  %v296_v38 = vstv %s976_s7  ;;  %s338_s19 = scalar_lea.sflag [#allocation4], %s939_s8  ;;  %s660_s6 = scalar_lea.vmem %s1023_s30, 128 }
  0x6b   : > { %v252_v32 = vadd.f32 %v251_v16, %v246_v23  ;;  %v301_v39 = vstv %s980_s29  ;;  %v297_v44 = vmul.f32 %v493_v31, %v296_v38  ;;  %v313_v48 = vstv %s983_s21  ;;  %p661_p4 = scmp.ne.s32.totalorder %s1023_s30, %s660_s6  ;;  %p1094_p12 = scmp.ne.s32.totalorder %s1087_s23, 0 }
  0x6c   : > { %v272_v42 = vadd.f32 %v271_v25, %v267_v33  ;;  %v293_v43 = vadd.f32 %v292_v35, %v288_v34  ;;  %v302_v47 = vmul.f32 %v495_v36, %v301_v39  ;;  %v317_v49 = vstv %s985_s28  ;;  %s757_s15 = smov [#allocation9]  }
  0x6d   : > { %v255_v41 = vadd.f32 %v254_v27, %v252_v32  ;;  %v322_v50 = vstv %s992_s9  ;;  %v314_v54 = vmul.f32 %v313_v48, %v311_v40  ;;  %v305_v56 = vstv %s990_s27  ;;  %p662_p0 = pnand %p661_p4, %p1094_p12  ;;  %s664_s7 = sshll.u32 %s757_s15, 4  ;;  %s665_s7 = int_to_ptr.vmem [resolvable:$false] %s664_s7 }
  0x6e   : > { %v277_v52 = vadd.f32 %v276_v28, %v272_v42  ;;  %v298_v53 = vadd.f32 %v297_v44, %v293_v43  ;;  %v318_v57 = vmul.f32 %v500_v45, %v317_v49  ;;  %v323_v58 = vmul.f32 %v502_v46, %v322_v50  ;;  %s666_s29 = scalar_lea.vmem %s665_s7, 256  ;;  %p667_p10 = scmp.lt.s32.totalorder %s1023_s30, %s665_s7 }
  0x6f   : > { %v256_v51 = vmax.f32 %v255_v41, 0.0  ;;  %v327_v59 = vstv %s996_s11  ;;  %v331_v7 = vstv %s1009_s10  ;;  %p663_p5 = pneg %p662_p0  ;;  %p668_p11 = scmp.lt.s32.totalorder %s666_s29, %s660_s6 }
  0x70   : > { %v280_v61 = vadd.f32 %v279_v37, %v277_v52  ;;  %v303_v62 = vadd.f32 %v302_v47, %v298_v53  ;;  %v319_v63 = vadd.f32 %v318_v57, %v314_v54  ;;  %v328_v1 = vmul.f32 %v504_v55, %v327_v59 }
  0x71   : > { %v257_v60 = vadd.f32 %v256_v51, %v952_v0  ;;  %p669_p3 = por %p668_p11, %p667_p10 }
  0x72   : > { %v281_v2 = vmax.f32 %v280_v61, 0.0  ;;  %v306_v3 = vadd.f32 %v305_v56, %v303_v62  ;;  %v324_v4 = vadd.f32 %v323_v58, %v319_v63 }
  0x73   : > { %258 = vst [vmem:[%s230_s20] sm:$0x3] %v257_v60  ;;  %p670_p7 = pnand %p669_p3, %p663_p5 }
  0x74   : > { %v282_v5 = vadd.f32 %v974_v11, %v281_v2  ;;  %v307_v6 = vmax.f32 %v306_v3, 0.0  ;;  %v329_v8 = vadd.f32 %v328_v1, %v324_v4 }
  0x76   : > { %489 = vst [vmem:[%s230_s20 + $0x2] sm:$0x3] %v282_v5  ;;  %v308_v0 = vadd.f32 %v493_v31, %v307_v6  ;;  %v332_v9 = vadd.f32 %v331_v7, %v329_v8 }
  0x78   : > { %498 = vst [vmem:[%s230_s20 + $0x4] sm:$0x3] %v308_v0  ;;  %v333_v10 = vmax.f32 %v332_v9, 0.0 }
  0x7a   : > { %v334_v11 = vadd.f32 %v504_v55, %v333_v10 }
  0x7c   : > { %507 = vst [vmem:[%s230_s20 + $0x6] sm:$0x3] %v334_v11 }
  0x7d   : > { %673 = shalt.err (!%p670_p7)
}
  0x7e   : > { %s674_s21 = scalar_lea.hbm %s1028_s18, 128  ;;  %s678_s9 = scalar_lea.hbm %s1080_s3, 256 }
  0x7f   : > { %p675_p9 = scmp.ne.s32.totalorder %s1028_s18, %s674_s21  ;;  %p679_p1 = scmp.lt.u32.totalorder %s1028_s18, %s1080_s3 }
  0x80   : > { %p680_p8 = scmp.lt.u32.totalorder %s678_s9, %s674_s21  ;;  %p682_p4 = scmp.lt.u32.totalorder %s674_s21, %s1028_s18 }
  0x81   : > { %p676_p2 = pnand %p675_p9, %p1094_p12 }
  0x82   : > { %p681_p13 = por %p680_p8, %p679_p1 }
  0x83   : > { %p677_p6 = pneg %p676_p2 }
  0x84   : > { %p683_p0 = por %p682_p4, %p681_p13 }
  0x86   : > { %p684_p5 = pnand %p683_p0, %p677_p6 }
  0x88   : > { %687 = shalt.err (!%p684_p5)
}
  0x89   : > { %s758_s20 = smov 32   ;;  %s759_s22 = smov 2  }
  0x8a   : > { %525 = dma.vmem_to_hbm [thread:$0]  (%p1094_p12), %s1023_s30, 128, %s1028_s18, %s338_s19, %s758_s20, %s758_s20, %s759_s22  }
  0x8b PF: > { %s367_s25 = sand.u32 1, %s730_s12   ;;  %p1095_p10 = scmp.ne.s32.totalorder %s1088_s24, 0 }
  0x8c   : > { %p1096_p11 = scmp.ge.s32.totalorder %s750_s17, 2  ;;  %s368_s4 = scalar_lea.sflag [#allocation4], %s367_s25 }
  0x8e   : > { %p539_p3 = pnand %p1096_p11, %p1095_p10 }
  0x90   : > { %725 = dma.done.wait (!%p539_p3), %s368_s4, 128  }
  0x91   : > { %727 = vsyncadd (!%p539_p3), %s368_s4, 4294967168  ;;  %s21_s17 = sadd.s32 1, %s750_s17   ;;  %s1097_s12 = smov %s734_s13 }
  0x92   : > { %p18_p7 = scmp.ge.s32.totalorder %s21_s17, 4   ;;  %s1098_s13 = smov %s738_s14 }
  0x93   : > { %s1099_s14 = smov %s896_s26  ;;  %s1100_s15 = smov %s746_s16 }
  0x94   : > { %s1101_s16 = smov %s1103_s5  ;;  %20 = sbr.rel (!%p18_p7) target bundleno = 8 (0x8), region = 93 }
  0x9b   :  { %373 = vsyncpa [#allocation3], 1 }
  0x9c   :  { %375 = vsyncpa [#allocation3 + $0x1], 1 }
  0x9d   :  { %376 = vsyncpa [#allocation4], 1 }
  0x9e   :  { %378 = vsyncpa [#allocation4 + $0x1], 1 }
  0x9f   :  { %379 = vsyncpa [#allocation5], 1 }
  0xa0   :  { %381 = vsyncpa [#allocation5 + $0x1], 1 }
  0xa1   :  { %382 = vsyncpa [#allocation6], 1 }
  0xa2   :  { %384 = vsyncpa [#allocation6 + $0x1], 1 }

</bundles_post_ra>
